<compile_context>
chip_gen: v5e
topology: v5e:2x2
jax: 0.10.0
libtpu: 0.0.40
codegen_flags: <defaults>
</compile_context>

<pallas_src>
import functools

import jax
import jax.numpy as jnp
from jax.experimental import pallas as pl
from jax.experimental.pallas import tpu as pltpu


def _round_up(x, m):
    return ((x + m - 1) // m) * m


def _mlp_kernel(x_ref, wgu_ref, wd_ref, o_ref, acc_ref, *, ti):
    """One (token-tile i, intermediate-tile j) step of the fused SwiGLU MLP.

    x_ref  : (tm, H)      token tile (resident across j)
    wgu_ref: (H, 2*ti)    [gate tile j | up tile j] packed columns
    wd_ref : (ti, H)      down_proj rows for tile j
    o_ref  : (tm, H)      output tile (written at last j)
    acc_ref: (tm, H) f32  down-proj accumulator (VMEM scratch)
    """
    j = pl.program_id(1)

    @pl.when(j == 0)
    def _():
        acc_ref[...] = jnp.zeros_like(acc_ref)

    x = x_ref[...]
    # Single MXU pass for gate + up projections of this intermediate tile.
    gu = jnp.dot(x, wgu_ref[...], preferred_element_type=jnp.float32)  # (tm, 2*ti)
    gate = gu[:, :ti]
    up = gu[:, ti:]
    # SiLU (Llama default hidden_act) gating, in f32.
    h = (gate * jax.nn.sigmoid(gate)) * up
    # Partial down projection for this intermediate tile, accumulated in f32.
    acc_ref[...] += jnp.dot(h.astype(wd_ref.dtype), wd_ref[...],
                            preferred_element_type=jnp.float32)

    @pl.when(j == pl.num_programs(1) - 1)
    def _():
        o_ref[...] = acc_ref[...].astype(o_ref.dtype)


@functools.partial(jax.jit, static_argnames=("tm", "ti", "vmem_limit_bytes"))
def llama_mlp(x, w_gate, w_up, w_down, *, tm=None, ti=None, vmem_limit_bytes=None):
    """x: (B, S, H) -> (B, S, H).  w_gate/w_up: (H, I); w_down: (I, H)."""
    B, S, H = x.shape
    I = w_gate.shape[1]
    M = B * S

    # Tile sizes: keep per-step overhead negligible while fitting VMEM on all
    # generations (v7x has only 64 MiB physical VMEM).  For production bf16
    # Llama shapes these defaults stream ~12 MB of weights per step.
    if tm is None:
        tm = min(512, _round_up(M, 8))
    if ti is None:
        ti = min(512, _round_up(I, 128))

    M_pad = _round_up(M, tm)
    I_pad = _round_up(I, ti)

    x2d = x.reshape(M, H)
    if M_pad != M:
        x2d = jnp.pad(x2d, ((0, M_pad - M), (0, 0)))
    wg, wu, wd = w_gate, w_up, w_down
    if I_pad != I:
        wg = jnp.pad(wg, ((0, 0), (0, I_pad - I)))
        wu = jnp.pad(wu, ((0, 0), (0, I_pad - I)))
        wd = jnp.pad(wd, ((0, I_pad - I), (0, 0)))

    n_i = I_pad // ti
    # Pack gate/up so that column block j of width 2*ti holds
    # [gate tile j | up tile j]  -> one (H, 2*ti) weight block per grid step.
    w_gu = jnp.concatenate(
        [wg.reshape(H, n_i, ti), wu.reshape(H, n_i, ti)], axis=2
    ).reshape(H, n_i * 2 * ti)

    if vmem_limit_bytes is None:
        x_bytes = jnp.dtype(x.dtype).itemsize
        w_bytes = jnp.dtype(w_gate.dtype).itemsize
        est = (2 * tm * H * x_bytes                      # x tile, 2 buffers
               + 2 * (H * 2 * ti + ti * H) * w_bytes     # weight tiles, 2 buffers
               + 2 * tm * H * x_bytes                    # output tile, 2 buffers
               + tm * H * 4)                             # f32 accumulator
        vmem_limit_bytes = int(min(max(2 * est, 32 << 20), 100 << 20))

    grid = (M_pad // tm, n_i)  # reduction (I) axis last

    out2d = pl.pallas_call(
        functools.partial(_mlp_kernel, ti=ti),
        out_shape=jax.ShapeDtypeStruct((M_pad, H), x.dtype),
        grid_spec=pltpu.PrefetchScalarGridSpec(
            num_scalar_prefetch=0,
            grid=grid,
            in_specs=[
                pl.BlockSpec((tm, H), lambda i, j: (i, 0)),       # x tile
                pl.BlockSpec((H, 2 * ti), lambda i, j: (0, j)),   # packed gate|up tile
                pl.BlockSpec((ti, H), lambda i, j: (j, 0)),       # down_proj tile
            ],
            out_specs=pl.BlockSpec((tm, H), lambda i, j: (i, 0)),
            scratch_shapes=[pltpu.VMEM((tm, H), jnp.float32)],
        ),
        compiler_params=pltpu.CompilerParams(
            dimension_semantics=("parallel", "arbitrary"),
            vmem_limit_bytes=vmem_limit_bytes),
    )(x2d, w_gu, wd)

    return out2d[:M].reshape(B, S, H)


def _reference(x, w_gate, w_up, w_down):
    gate = jnp.einsum("bsh,hi->bsi", x, w_gate).astype(jnp.float32)
    up = jnp.einsum("bsh,hi->bsi", x, w_up).astype(jnp.float32)
    h = (gate * jax.nn.sigmoid(gate)) * up
    return jnp.einsum("bsi,ih->bsh", h.astype(x.dtype), w_down)


def _make_inputs(key, batch, seq, hidden, inter, dtype):
    kx, kg, ku, kd = jax.random.split(key, 4)
    x = jax.random.normal(kx, (batch, seq, hidden), dtype=dtype)
    w_gate = jax.random.normal(kg, (hidden, inter), dtype=dtype) * 0.05
    w_up = jax.random.normal(ku, (hidden, inter), dtype=dtype) * 0.05
    w_down = jax.random.normal(kd, (inter, hidden), dtype=dtype) * 0.05
    return x, w_gate, w_up, w_down


if __name__ == "__main__":
    key = jax.random.PRNGKey(0)
    k1, k2 = jax.random.split(key)
    dtype = jnp.float32

    # Small config consistent with the module: hidden_size=32,
    # intermediate_size=64, mlp_bias=False, hidden_act="silu".
    batch, seq, hidden, inter = 2, 8, 32, 64
    x, wg, wu, wd = _make_inputs(k1, batch, seq, hidden, inter, dtype)
    out = jax.block_until_ready(llama_mlp(x, wg, wu, wd))
    ref = _reference(x, wg, wu, wd)
    assert out.shape == (batch, seq, hidden)
    assert jnp.allclose(out, ref, atol=5e-3, rtol=5e-3), "mismatch (config 1)"

    # Second config forcing a multi-tile grid (3 token tiles x 3 intermediate
    # tiles) to exercise the streamed-weight accumulation path.
    batch2, seq2, hidden2, inter2 = 2, 24, 256, 384
    x2, wg2, wu2, wd2 = _make_inputs(k2, batch2, seq2, hidden2, inter2, dtype)
    out2 = jax.block_until_ready(llama_mlp(x2, wg2, wu2, wd2, tm=16, ti=128))
    ref2 = _reference(x2, wg2, wu2, wd2)
    assert out2.shape == (batch2, seq2, hidden2)
    assert jnp.allclose(out2, ref2, atol=5e-3, rtol=5e-3), "mismatch (config 2)"

    print("KERNEL_OK")
</pallas_src>

<mosaic_0001>
module attributes {stable_mosaic.version = 11 : i64} {
  func.func @_mlp_kernel(%arg0: i32, %arg1: i32, %arg2: memref<16x32xf32, #tpu.memory_space<vmem>>, %arg3: memref<32x256xf32, #tpu.memory_space<vmem>>, %arg4: memref<128x32xf32, #tpu.memory_space<vmem>>, %arg5: memref<16x32xf32, #tpu.memory_space<vmem>>, %arg6: memref<16x32xf32, #tpu.memory_space<vmem>>) attributes {dimension_semantics = [#tpu.dimension_semantics<parallel>, #tpu.dimension_semantics<arbitrary>], iteration_bounds = array<i64: 1, 1>, scalar_prefetch = 0 : i64, scratch_operands = 1 : i64, tpu.core_type = #tpu.core_type<tc>, window_params = [{transform_indices = @transform_0, window_bounds = array<i64: 16, 32>}, {transform_indices = @transform_1, window_bounds = array<i64: 32, 256>}, {transform_indices = @transform_2, window_bounds = array<i64: 128, 32>}, {transform_indices = @transform_3, window_bounds = array<i64: 16, 32>}]} {
    %c0_i32 = arith.constant 0 : i32
    %0 = arith.cmpi eq, %arg1, %c0_i32 : i32
    %1 = arith.extui %0 : i1 to i32
    %c0_i32_0 = arith.constant 0 : i32
    %2 = arith.cmpi ne, %1, %c0_i32_0 : i32
    scf.if %2 {
      %cst_14 = arith.constant 0.000000e+00 : f32
      %23 = vector.broadcast %cst_14 : f32 to vector<16x32xf32>
      %c0_15 = arith.constant 0 : index
      %c0_16 = arith.constant 0 : index
      %24 = vector.load %arg6[%c0_15, %c0_16] : memref<16x32xf32, #tpu.memory_space<vmem>>, vector<16x32xf32>
      tpu.vector_store %arg6[%c0_15, %c0_16], %23 {strides = array<i32>} : memref<16x32xf32, #tpu.memory_space<vmem>>, vector<16x32xf32>,
    } else {
    }
    %c0 = arith.constant 0 : index
    %c0_1 = arith.constant 0 : index
    %3 = vector.load %arg2[%c0, %c0_1] : memref<16x32xf32, #tpu.memory_space<vmem>>, vector<16x32xf32>
    %c0_2 = arith.constant 0 : index
    %c0_3 = arith.constant 0 : index
    %4 = vector.load %arg3[%c0_2, %c0_3] : memref<32x256xf32, #tpu.memory_space<vmem>>, vector<32x256xf32>
    %cst = arith.constant dense<0.000000e+00> : vector<16x256xf32>
    %5 = tpu.matmul %3, %4, %cst {dimension_numbers = #tpu.dot_dimension_numbers<[1], [0], [0], [1], [0, 0, 1, 1], [], []>} : vector<16x32xf32>, vector<32x256xf32>, vector<16x256xf32> -> vector<16x256xf32>
    %6 = vector.extract_strided_slice %5 {offsets = [0, 0], sizes = [16, 128], strides = [1, 1]} : vector<16x256xf32> to vector<16x128xf32>
    %7 = vector.extract_strided_slice %5 {offsets = [0, 128], sizes = [16, 128], strides = [1, 1]} : vector<16x256xf32> to vector<16x128xf32>
    %8 = arith.negf %6 : vector<16x128xf32>
    %9 = math.exp %8 : vector<16x128xf32>
    %cst_4 = arith.constant 1.000000e+00 : f32
    %10 = vector.broadcast %cst_4 : f32 to vector<16x128xf32>
    %11 = arith.addf %10, %9 : vector<16x128xf32>
    %12 = arith.divf %10, %11 : vector<16x128xf32>
    %13 = arith.mulf %6, %12 : vector<16x128xf32>
    %14 = arith.mulf %13, %7 : vector<16x128xf32>
    %c0_5 = arith.constant 0 : index
    %c0_6 = arith.constant 0 : index
    %15 = vector.load %arg6[%c0_5, %c0_6] : memref<16x32xf32, #tpu.memory_space<vmem>>, vector<16x32xf32>
    %c0_7 = arith.constant 0 : index
    %c0_8 = arith.constant 0 : index
    %16 = vector.load %arg4[%c0_7, %c0_8] : memref<128x32xf32, #tpu.memory_space<vmem>>, vector<128x32xf32>
    %cst_9 = arith.constant dense<0.000000e+00> : vector<16x32xf32>
    %17 = tpu.matmul %14, %16, %cst_9 {dimension_numbers = #tpu.dot_dimension_numbers<[1], [0], [0], [1], [0, 0, 1, 1], [], []>} : vector<16x128xf32>, vector<128x32xf32>, vector<16x32xf32> -> vector<16x32xf32>
    %18 = arith.addf %15, %17 : vector<16x32xf32>
    %c0_10 = arith.constant 0 : index
    %c0_11 = arith.constant 0 : index
    %19 = vector.load %arg6[%c0_10, %c0_11] : memref<16x32xf32, #tpu.memory_space<vmem>>, vector<16x32xf32>
    tpu.vector_store %arg6[%c0_10, %c0_11], %18 {strides = array<i32>} : memref<16x32xf32, #tpu.memory_space<vmem>>, vector<16x32xf32>,
    %c0_i32_12 = arith.constant 0 : i32
    %20 = arith.cmpi eq, %arg1, %c0_i32_12 : i32
    %21 = arith.extui %20 : i1 to i32
    %c0_i32_13 = arith.constant 0 : i32
    %22 = arith.cmpi ne, %21, %c0_i32_13 : i32
    scf.if %22 {
      %c0_14 = arith.constant 0 : index
      %c0_15 = arith.constant 0 : index
      %23 = vector.load %arg6[%c0_14, %c0_15] : memref<16x32xf32, #tpu.memory_space<vmem>>, vector<16x32xf32>
      %c0_16 = arith.constant 0 : index
      %c0_17 = arith.constant 0 : index
      %24 = vector.load %arg5[%c0_16, %c0_17] : memref<16x32xf32, #tpu.memory_space<vmem>>, vector<16x32xf32>
      tpu.vector_store %arg5[%c0_16, %c0_17], %23 {strides = array<i32>} : memref<16x32xf32, #tpu.memory_space<vmem>>, vector<16x32xf32>,
    } else {
    }
    return
  }
  func.func @transform_0(%arg0: i32, %arg1: i32) -> (i32, i32) {
    %c0_i32 = arith.constant 0 : i32
    %c0_i32_0 = arith.constant 0 : i32
    return %arg0, %c0_i32 : i32, i32
  }
  func.func @transform_1(%arg0: i32, %arg1: i32) -> (i32, i32) {
    %c0_i32 = arith.constant 0 : i32
    %c0_i32_0 = arith.constant 0 : i32
    return %c0_i32, %arg1 : i32, i32
  }
  func.func @transform_2(%arg0: i32, %arg1: i32) -> (i32, i32) {
    %c0_i32 = arith.constant 0 : i32
    %c0_i32_0 = arith.constant 0 : i32
    return %arg1, %c0_i32 : i32, i32
  }
  func.func @transform_3(%arg0: i32, %arg1: i32) -> (i32, i32) {
    %c0_i32 = arith.constant 0 : i32
    %c0_i32_0 = arith.constant 0 : i32
    return %arg0, %c0_i32 : i32, i32
  }
}

</mosaic_0001>

<bundles_post_ra>
// kernel: llama_mlp.1
= control target key start
LH: loop header
LB: loop body
LE: loop exit
PB: predicated region body
PF: predicated region fallthrough
CT: control target
= control target key end

     0   :  { %s372_s0 = inlined_call_operand.vmem [shape: f32[16,32], index: 0, kind: input, shape index: {}]   ;;  %s373_s1 = inlined_call_operand.vmem [shape: f32[32,256], index: 1, kind: input, shape index: {}]   ;;  %s374_s2 = inlined_call_operand.vmem [shape: f32[128,32], index: 2, kind: input, shape index: {}]   ;;  %s375_s3 = inlined_call_operand.hbm [shape: f32[16,32], index: 3, kind: output, shape index: {}]  }
   0x1   :  { %v30_v0 = vld [vmem:[%s373_s1 + $0x30] sm:$0xff]  ;;  %v28_v1 = vld [vmem:[%s373_s1 + $0x20] sm:$0xff]  ;;  %v31_v3 = vld [vmem:[%s373_s1 + $0x38] sm:$0xff] }
   0x2   :  { %51 = vmatpush.msra.mxu0 %v30_v0  ;;  %v26_v2 = vld [vmem:[%s373_s1 + $0x10] sm:$0xff]  ;;  %v29_v4 = vld [vmem:[%s373_s1 + $0x28] sm:$0xff]  ;;  %74 = vmatpush.msra.mxu1 %v31_v3 }
   0x4   :  { %52 = vmatpush.msra.mxu0 %v28_v1 }
   0x5   :  { %8 = vsyncpa [#allocation4], 0  ;;  %v24_v5 = vld [vmem:[%s373_s1] sm:$0xff]  ;;  %v27_v6 = vld [vmem:[%s373_s1 + $0x18] sm:$0xff]  ;;  %vm19_vm0 = vcmask 261120   ;;  %75 = vmatpush.msra.mxu1 %v29_v4  ;;  %v257_v32 = vmov 0.0  }
   0x6   :  { %53 = vmatpush.msra.mxu0 %v26_v2  ;;  %v22_v7 = vld [vmem:[%s372_s0] sm:$0xff]  ;;  %v25_v8 = vld [vmem:[%s373_s1 + $0x8] sm:$0xff]  ;;  %v144_v10 = vld [vmem:[%s374_s2 + $0x78] sm:$0xff]  ;;  %20 = vst.msk [vmem:[#allocation2] sm:$0xff] %vm19_vm0, %v257_v32  ;;  %s259_s10 = smov 128   ;;  %s260_s11 = smov 8  }
   0x7   :  { %76 = vmatpush.msra.mxu1 %v27_v6  ;;  %v23_v9 = vld [vmem:[%s372_s0 + $0x8] sm:$0xff]  ;;  %145 = vmatpush.msra.mxu2 %v144_v10  ;;  %v143_v11 = vld [vmem:[%s374_s2 + $0x70] sm:$0xff]  ;;  %v141_v13 = vld [vmem:[%s374_s2 + $0x60] sm:$0xff]  ;;  %21 = vst.msk [vmem:[#allocation2 + $0x8] sm:$0xff] %vm19_vm0, %v257_v32  ;;  %s185_s0 = sshll.u32 %s375_s3, 4  ;;  %s186_s0 = int_to_ptr.hbm [resolvable:$true] %s185_s0 }
   0x8   :  { %54 = vmatpush.msra.mxu0 %v24_v5  ;;  %203 = vmatpush.msra.mxu3 %v144_v10  ;;  %v142_v12 = vld [vmem:[%s374_s2 + $0x68] sm:$0xff]  ;;  %v140_v14 = vld [vmem:[%s374_s2 + $0x58] sm:$0xff]  ;;  %v139_v15 = vld [vmem:[%s374_s2 + $0x50] sm:$0xff] }
   0x9   :  { %197 = vmatmul.msk.f32.vlgmr.msra.gmra.mxu0 %vm19_vm0, %v22_v7  ;;  %77 = vmatpush.msra.mxu1 %v25_v8  ;;  %v138_v16 = vld [vmem:[%s374_s2 + $0x48] sm:$0xff]  ;;  %v137_v17 = vld [vmem:[%s374_s2 + $0x40] sm:$0xff]  ;;  %v136_v18 = vld [vmem:[%s374_s2 + $0x38] sm:$0xff] }
   0xa   :  { %199 = vmatmul.msk.f32.vlgmr.msra.gmra.mxu1 %vm19_vm0, %v22_v7  ;;  %146 = vmatpush.msra.mxu2 %v143_v11  ;;  %v135_v19 = vld [vmem:[%s374_s2 + $0x30] sm:$0xff]  ;;  %v134_v20 = vld [vmem:[%s374_s2 + $0x28] sm:$0xff]  ;;  %v133_v21 = vld [vmem:[%s374_s2 + $0x20] sm:$0xff] }
   0xb   :  { %204 = vmatpush.msra.mxu3 %v143_v11  ;;  %v132_v22 = vld [vmem:[%s374_s2 + $0x18] sm:$0xff]  ;;  %v131_v23 = vld [vmem:[%s374_s2 + $0x10] sm:$0xff]  ;;  %v130_v24 = vld [vmem:[%s374_s2 + $0x8] sm:$0xff] }
   0xc   :  { %147 = vmatpush.msra.mxu2 %v142_v12  ;;  %v129_v25 = vld [vmem:[%s374_s2] sm:$0xff]  ;;  %s258_s2 = smov [#allocation3]  }
   0xd   :  { %205 = vmatpush.msra.mxu3 %v142_v12  ;;  %v127_v61 = vld [vmem:[#allocation2] sm:$0xff]  ;;  %s183_s7 = sshll.u32 %s258_s2, 4  ;;  %s184_s7 = int_to_ptr.vmem [resolvable:$true] %s183_s7 }
   0xe   :  { %148 = vmatpush.msra.mxu2 %v141_v13  ;;  %v128_v0 = vld [vmem:[#allocation2 + $0x8] sm:$0xff] }
   0xf   :  { %206 = vmatpush.msra.mxu3 %v141_v13 }
  0x10   :  { %149 = vmatpush.msra.mxu2 %v140_v14 }
  0x11   :  { %198 = vmatmul.msk.f32.gmra.mxu0 %vm19_vm0, %v23_v9  ;;  %207 = vmatpush.msra.mxu3 %v140_v14 }
  0x12   :  { %200 = vmatmul.msk.f32.gmra.mxu1 %vm19_vm0, %v23_v9  ;;  %150 = vmatpush.msra.mxu2 %v139_v15 }
  0x13   :  { %208 = vmatpush.msra.mxu3 %v139_v15 }
  0x14   :  { %151 = vmatpush.msra.mxu2 %v138_v16 }
  0x15   :  { %209 = vmatpush.msra.mxu3 %v138_v16 }
  0x16   :  { %152 = vmatpush.msra.mxu2 %v137_v17 }
  0x17   :  { %210 = vmatpush.msra.mxu3 %v137_v17 }
  0x18   :  { %153 = vmatpush.msra.mxu2 %v136_v18 }
  0x19   :  { %211 = vmatpush.msra.mxu3 %v136_v18 }
  0x1a   :  { %154 = vmatpush.msra.mxu2 %v135_v19 }
  0x1b   :  { %212 = vmatpush.msra.mxu3 %v135_v19 }
  0x1c   :  { %155 = vmatpush.msra.mxu2 %v134_v20 }
  0x1d   :  { %213 = vmatpush.msra.mxu3 %v134_v20 }
  0x1e   :  { %156 = vmatpush.msra.mxu2 %v133_v21 }
  0x1f   :  { %214 = vmatpush.msra.mxu3 %v133_v21 }
  0x20   :  { %157 = vmatpush.msra.mxu2 %v132_v22 }
  0x21   :  { %215 = vmatpush.msra.mxu3 %v132_v22 }
  0x22   :  { %158 = vmatpush.msra.mxu2 %v131_v23 }
  0x23   :  { %216 = vmatpush.msra.mxu3 %v131_v23 }
  0x24   :  { %159 = vmatpush.msra.mxu2 %v130_v24 }
  0x25   :  { %217 = vmatpush.msra.mxu3 %v130_v24 }
  0x26   :  { %160 = vmatpush.msra.mxu2 %v129_v25 }
  0x27   :  { %218 = vmatpush.msra.mxu3 %v129_v25 }
  0x86   :  { %v56_v26 = vpop.f32.mrf.mxu0 }
  0x87   :  { %v201_v27 = vmul.f32 -1.442695, %v56_v26  ;;  %v79_v44 = vpop.f32.mrf.mxu1 }
  0x89   :  { %223 = vpow2.f32 %v201_v27 }
  0x8e   :  { %v59_v28 = vpop.f32.mrf.mxu0 }
  0x8f   :  { %v224_v29 = vpop.eup %223  ;;  %v202_v30 = vmul.f32 -1.442695, %v59_v28  ;;  %v82_v58 = vpop.f32.mrf.mxu1 }
  0x90   :  { %v91_v31 = vadd.f32 1.0, %v224_v29 }
  0x91   :  { %225 = vpow2.f32 %v202_v30 }
  0x92   :  { %227 = vrcp.f32 %v91_v31  ;;  %v104_v38 = vand.u32 2147483648, %v91_v31  ;;  %v102_v40 = vand.u32 2147483647, %v91_v31  ;;  %vm98_vm2 = vweird.f32 %v91_v31 }
  0x94   :  { %v105_v43 = vor.u32 1.1754944e-38, %v104_v38  ;;  %vm103_vm4 = vcmp.eq.f32.partialorder %v102_v40, 8.507059e+37 }
  0x97   :  { %v226_v33 = vpop.eup %225 }
  0x98   :  { %v228_v34 = vpop.eup %227  ;;  %v92_v35 = vadd.f32 1.0, %v226_v33 }
  0x99   :  { %v94_v36 = vmul.f32 %v228_v34, %v91_v31  ;;  %vm99_vm1 = vweird.f32 %v228_v34 }
  0x9a   :  { %229 = vrcp.f32 %v92_v35  ;;  %vm100_vm3 = vmor %vm98_vm2, %vm99_vm1  ;;  %v119_v50 = vand.u32 2147483648, %v92_v35  ;;  %v117_v52 = vand.u32 2147483647, %v92_v35  ;;  %vm113_vm6 = vweird.f32 %v92_v35 }
  0x9b   :  { %v95_v37 = vsub.f32 1.0, %v94_v36 }
  0x9c   :  { %v120_v55 = vor.u32 1.1754944e-38, %v119_v50  ;;  %vm118_vm8 = vcmp.eq.f32.partialorder %v117_v52, 8.507059e+37 }
  0x9d   :  { %v96_v39 = vmul.f32 %v228_v34, %v95_v37 }
  0x9f   :  { %v97_v41 = vadd.f32 %v228_v34, %v96_v39 }
  0xa0   :  { %v230_v42 = vpop.eup %229 }
  0xa1   :  { %v101_v45 = vsel %vm100_vm3, %v228_v34, %v97_v41  ;;  %v109_v46 = vmul.f32 %v230_v42, %v92_v35  ;;  %vm114_vm5 = vweird.f32 %v230_v42 }
  0xa2   :  { %v106_v47 = vsel %vm103_vm4, %v105_v43, %v101_v45  ;;  %vm115_vm7 = vmor %vm113_vm6, %vm114_vm5 }
  0xa3   :  { %v123_v48 = vmul.f32 %v106_v47, %v56_v26  ;;  %v110_v49 = vsub.f32 1.0, %v109_v46 }
  0xa5   :  { %v111_v51 = vmul.f32 %v230_v42, %v110_v49  ;;  %v125_v53 = vmul.f32 %v123_v48, %v79_v44 }
  0xa7   :  { %v112_v54 = vadd.f32 %v230_v42, %v111_v51  ;;  %161 = vmatmul.f32.vlgmr.msra.gmra.mxu2 %v125_v53 }
  0xa9   :  { %v116_v56 = vsel %vm115_vm7, %v230_v42, %v112_v54 }
  0xaa   :  { %v121_v57 = vsel %vm118_vm8, %v120_v55, %v116_v56 }
  0xab   :  { %v124_v59 = vmul.f32 %v121_v57, %v59_v28 }
  0xad   :  { %v126_v60 = vmul.f32 %v124_v59, %v82_v58 }
  0xaf   :  { %164 = vmatmul.f32.vlgmr.msra.gmra.mxu3 %v126_v60 }
 0x12a   :  { %v162_v62 = vpop.f32.mrf.mxu2 }
 0x12b   :  { %v168_v63 = vadd.f32 %v162_v62, %v127_v61 }
 0x12d   :  { %170 = vst.msk [vmem:[#allocation2] sm:$0xff] %vm19_vm0, %v168_v63 }
 0x132   :  { %v165_v1 = vpop.f32.mrf.mxu3 }
 0x133   :  { %v169_v2 = vadd.f32 %v165_v1, %v128_v0 }
 0x134   :  { %v175_v3 = vld [vmem:[#allocation2] sm:$0xff] }
 0x135   :  { %171 = vst.msk [vmem:[#allocation2 + $0x8] sm:$0xff] %vm19_vm0, %v169_v2 }
 0x136   :  { %177 = vst.msk [vmem:[#allocation3] sm:$0xff] %vm19_vm0, %v175_v3 }
 0x13c   :  { %v176_v4 = vld [vmem:[#allocation2 + $0x8] sm:$0xff] }
 0x13d   :  { %178 = vst.msk [vmem:[#allocation3 + $0x8] sm:$0xff] %vm19_vm0, %v176_v4 }
 0x13e   :  { %191 = dma.vmem_to_hbm [thread:$0]  %s184_s7, 256, %s186_s0, [#allocation4], %s259_s10, %s259_s10, %s260_s11  }
 0x13f   :  { %255 = dma.done.wait [#allocation4], 256  }
 0x140   :  { %256 = vsyncadd [#allocation4], 4294967040 }
 0x141   :  { %196 = vsyncpa [#allocation4], 1 }

</bundles_post_ra>
